<compile_context>
chip_gen: v7x
topology: tpu7x:2x2x1
jax: 0.10.0
libtpu: 0.0.40
codegen_flags: <defaults>
</compile_context>

<pallas_src>
import functools

import jax
import jax.numpy as jnp
import numpy as np
from jax.experimental import pallas as pl
from jax.experimental.pallas import tpu as pltpu


def _round_up(x, m):
    return (x + m - 1) // m * m


def sine_layer_kernel(x_ref, w_ref, b_ref, o_ref, acc_ref, *, omega_0):
    """Grid = (M tiles, N tiles, K tiles); K is the reduction axis (last)."""
    k = pl.program_id(2)

    @pl.when(k == 0)
    def _():
        acc_ref[...] = jnp.zeros_like(acc_ref)

    # MXU matmul with f32 accumulation into the VMEM scratch.
    acc_ref[...] += jnp.dot(
        x_ref[...], w_ref[...], preferred_element_type=jnp.float32
    )

    @pl.when(k == pl.num_programs(2) - 1)
    def _():
        # Bias broadcast (1, tn) + (tm, tn), then sin on the VPU. Done once
        # per output tile (not per K step).
        o_ref[...] = jnp.sin(
            omega_0 * (acc_ref[...] + b_ref[...])
        ).astype(o_ref.dtype)


def sine_layer(x, w, b, *, omega_0=30.0, tm=512, tn=512, tk=512):
    """x: (M, K), w: (K, N), b: (N,)  ->  sin(omega_0 * (x @ w + b)), (M, N)."""
    M, K = x.shape
    K2, N = w.shape
    assert K == K2 and b.shape == (N,)

    # Tile sizes: clamp to the (8/128-rounded) problem size so tiny problems
    # don't over-pad, keep 8-alignment on sublanes and 128 on lanes
    # (256-multiples preferred on v6e/v7x MXU when the problem is big enough).
    tm = min(tm, _round_up(M, 8))
    tn = min(tn, _round_up(N, 128))
    tk = min(tk, _round_up(K, 128))

    Mp = _round_up(M, tm)
    Np = _round_up(N, tn)
    Kp = _round_up(K, tk)

    # Zero-pad to tile multiples (zeros contribute nothing to the matmul;
    # padded output rows/cols are sliced off below).  Padded N keeps output
    # stores lane-dense (unmasked vst).
    xp = jnp.pad(x, ((0, Mp - M), (0, Kp - K)))
    wp = jnp.pad(w, ((0, Kp - K), (0, Np - N)))
    bp = jnp.pad(b, (0, Np - N)).reshape(1, Np)

    grid = (Mp // tm, Np // tn, Kp // tk)

    # VMEM budget: double-buffered x/w/b/out tiles + f32 accumulator scratch.
    # Stays well inside v7x's 64 MiB even at 512^3 tiles (~8 MiB).
    vmem_need = 4 * (2 * (tm * tk + tk * tn + tn) + 3 * tm * tn)
    vmem_limit = min(max(vmem_need + (4 << 20), 16 << 20), 48 << 20)

    cost = pl.CostEstimate(
        flops=2 * M * K * N,
        transcendentals=M * N,
        bytes_accessed=4 * (M * K + K * N + M * N + N),
    )

    kernel = functools.partial(sine_layer_kernel, omega_0=float(omega_0))
    out_p = pl.pallas_call(
        kernel,
        out_shape=jax.ShapeDtypeStruct((Mp, Np), x.dtype),
        grid_spec=pltpu.PrefetchScalarGridSpec(
            num_scalar_prefetch=0,
            grid=grid,
            in_specs=[
                pl.BlockSpec((tm, tk), lambda i, j, k: (i, k)),   # x tile
                pl.BlockSpec((tk, tn), lambda i, j, k: (k, j)),   # w tile
                pl.BlockSpec((1, tn), lambda i, j, k: (0, j)),    # bias row
            ],
            out_specs=pl.BlockSpec((tm, tn), lambda i, j, k: (i, j)),
            scratch_shapes=[pltpu.VMEM((tm, tn), jnp.float32)],
        ),
        compiler_params=pltpu.CompilerParams(
            # M/N parallel (sharded across v7x's 2 TensorCores when the grid
            # has >= 2 steps), K reduction last and "arbitrary".
            dimension_semantics=("parallel", "parallel", "arbitrary"),
            vmem_limit_bytes=vmem_limit,
        ),
        cost_estimate=cost,
    )(xp, wp, bp)

    return out_p[:M, :N]


def init_sine_layer_params(key, in_features, out_features,
                           is_first=False, omega_0=30.0):
    """Deterministic parameter init matching SineLayer.init_weights."""
    kw, kb = jax.random.split(key)
    if is_first:
        bound = 1.0 / in_features
    else:
        bound = np.sqrt(6.0 / in_features) / omega_0
    # weight stored as (in_features, out_features) == W^T
    w = jax.random.uniform(kw, (in_features, out_features), jnp.float32,
                           minval=-bound, maxval=bound)
    # nn.Linear default bias init: U(-1/sqrt(in), 1/sqrt(in))
    b_bound = 1.0 / np.sqrt(in_features)
    b = jax.random.uniform(kb, (out_features,), jnp.float32,
                           minval=-b_bound, maxval=b_bound)
    return w, b


if __name__ == "__main__":
    key = jax.random.PRNGKey(0)
    k_x, k_p = jax.random.split(key)

    # Small shapes; batch deliberately not a multiple of 8 to exercise the
    # padding path, out_features=64 exercises lane padding to 128.
    batch, in_features, out_features = 37, 32, 64
    omega_0 = 30.0
    is_first = True

    x = jax.random.normal(k_x, (batch, in_features), jnp.float32)
    w, b = init_sine_layer_params(k_p, in_features, out_features,
                                  is_first=is_first, omega_0=omega_0)

    out = sine_layer(x, w, b, omega_0=omega_0)
    out = jax.block_until_ready(out)

    # High-precision host-side reference (avoids TPU default matmul precision
    # differences in the reference itself).
    x_np, w_np, b_np = np.asarray(x), np.asarray(w), np.asarray(b)
    ref = np.sin(omega_0 * (x_np.astype(np.float64) @ w_np.astype(np.float64)
                            + b_np.astype(np.float64)))
    np.testing.assert_allclose(np.asarray(out), ref, rtol=1e-4, atol=1e-5)
    print("KERNEL_OK")
</pallas_src>

<mosaic_0001>
module attributes {stable_mosaic.version = 11 : i64} {
  func.func @sine_layer_kernel(%arg0: i32, %arg1: i32, %arg2: i32, %arg3: memref<40x128xf32, #tpu.memory_space<vmem>>, %arg4: memref<128x128xf32, #tpu.memory_space<vmem>>, %arg5: memref<1x128xf32, #tpu.memory_space<vmem>>, %arg6: memref<40x128xf32, #tpu.memory_space<vmem>>, %arg7: memref<40x128xf32, #tpu.memory_space<vmem>>) attributes {dimension_semantics = [#tpu.dimension_semantics<parallel>, #tpu.dimension_semantics<parallel>, #tpu.dimension_semantics<arbitrary>], iteration_bounds = array<i64: 1, 1, 1>, scalar_prefetch = 0 : i64, scratch_operands = 1 : i64, tpu.core_type = #tpu.core_type<tc>, window_params = [{transform_indices = @transform_0, window_bounds = array<i64: 40, 128>}, {transform_indices = @transform_1, window_bounds = array<i64: 128, 128>}, {transform_indices = @transform_2, window_bounds = array<i64: 1, 128>}, {transform_indices = @transform_3, window_bounds = array<i64: 40, 128>}]} {
    %c0_i32 = arith.constant 0 : i32
    %0 = arith.cmpi eq, %arg2, %c0_i32 : i32
    %1 = arith.extui %0 : i1 to i32
    %c0_i32_0 = arith.constant 0 : i32
    %2 = arith.cmpi ne, %1, %c0_i32_0 : i32
    scf.if %2 {
      %cst_10 = arith.constant 0.000000e+00 : f32
      %12 = vector.broadcast %cst_10 : f32 to vector<40x128xf32>
      %c0_11 = arith.constant 0 : index
      %c0_12 = arith.constant 0 : index
      %13 = vector.load %arg7[%c0_11, %c0_12] : memref<40x128xf32, #tpu.memory_space<vmem>>, vector<40x128xf32>
      tpu.vector_store %arg7[%c0_11, %c0_12], %12 {strides = array<i32>} : memref<40x128xf32, #tpu.memory_space<vmem>>, vector<40x128xf32>,
    } else {
    }
    %c0 = arith.constant 0 : index
    %c0_1 = arith.constant 0 : index
    %3 = vector.load %arg7[%c0, %c0_1] : memref<40x128xf32, #tpu.memory_space<vmem>>, vector<40x128xf32>
    %c0_2 = arith.constant 0 : index
    %c0_3 = arith.constant 0 : index
    %4 = vector.load %arg3[%c0_2, %c0_3] : memref<40x128xf32, #tpu.memory_space<vmem>>, vector<40x128xf32>
    %c0_4 = arith.constant 0 : index
    %c0_5 = arith.constant 0 : index
    %5 = vector.load %arg4[%c0_4, %c0_5] : memref<128x128xf32, #tpu.memory_space<vmem>>, vector<128x128xf32>
    %cst = arith.constant dense<0.000000e+00> : vector<40x128xf32>
    %6 = tpu.matmul %4, %5, %cst {dimension_numbers = #tpu.dot_dimension_numbers<[1], [0], [0], [1], [0, 0, 1, 1], [], []>} : vector<40x128xf32>, vector<128x128xf32>, vector<40x128xf32> -> vector<40x128xf32>
    %7 = arith.addf %3, %6 : vector<40x128xf32>
    %c0_6 = arith.constant 0 : index
    %c0_7 = arith.constant 0 : index
    %8 = vector.load %arg7[%c0_6, %c0_7] : memref<40x128xf32, #tpu.memory_space<vmem>>, vector<40x128xf32>
    tpu.vector_store %arg7[%c0_6, %c0_7], %7 {strides = array<i32>} : memref<40x128xf32, #tpu.memory_space<vmem>>, vector<40x128xf32>,
    %c0_i32_8 = arith.constant 0 : i32
    %9 = arith.cmpi eq, %arg2, %c0_i32_8 : i32
    %10 = arith.extui %9 : i1 to i32
    %c0_i32_9 = arith.constant 0 : i32
    %11 = arith.cmpi ne, %10, %c0_i32_9 : i32
    scf.if %11 {
      %c0_10 = arith.constant 0 : index
      %c0_11 = arith.constant 0 : index
      %12 = vector.load %arg7[%c0_10, %c0_11] : memref<40x128xf32, #tpu.memory_space<vmem>>, vector<40x128xf32>
      %c0_12 = arith.constant 0 : index
      %c0_13 = arith.constant 0 : index
      %13 = vector.load %arg5[%c0_12, %c0_13] : memref<1x128xf32, #tpu.memory_space<vmem>>, vector<1x128xf32>
      %14 = vector.broadcast %13 : vector<1x128xf32> to vector<40x128xf32>
      %15 = arith.addf %12, %14 : vector<40x128xf32>
      %cst_14 = arith.constant 3.000000e+01 : f32
      %16 = vector.broadcast %cst_14 : f32 to vector<40x128xf32>
      %17 = arith.mulf %16, %15 : vector<40x128xf32>
      %18 = math.sin %17 : vector<40x128xf32>
      %c0_15 = arith.constant 0 : index
      %c0_16 = arith.constant 0 : index
      %19 = vector.load %arg6[%c0_15, %c0_16] : memref<40x128xf32, #tpu.memory_space<vmem>>, vector<40x128xf32>
      tpu.vector_store %arg6[%c0_15, %c0_16], %18 {strides = array<i32>} : memref<40x128xf32, #tpu.memory_space<vmem>>, vector<40x128xf32>,
    } else {
    }
    return
  }
  func.func @transform_0(%arg0: i32, %arg1: i32, %arg2: i32) -> (i32, i32) {
    %c0_i32 = arith.constant 0 : i32
    return %arg0, %arg2 : i32, i32
  }
  func.func @transform_1(%arg0: i32, %arg1: i32, %arg2: i32) -> (i32, i32) {
    %c0_i32 = arith.constant 0 : i32
    return %arg2, %arg1 : i32, i32
  }
  func.func @transform_2(%arg0: i32, %arg1: i32, %arg2: i32) -> (i32, i32) {
    %c0_i32 = arith.constant 0 : i32
    %c0_i32_0 = arith.constant 0 : i32
    return %c0_i32, %arg1 : i32, i32
  }
  func.func @transform_3(%arg0: i32, %arg1: i32, %arg2: i32) -> (i32, i32) {
    %c0_i32 = arith.constant 0 : i32
    return %arg0, %arg1 : i32, i32
  }
}

</mosaic_0001>

<bundles_post_ra>
// kernel: tpu_custom_call.1
= control target key start
LH: loop header
LB: loop body
LE: loop exit
PB: predicated region body
PF: predicated region fallthrough
CT: control target
= control target key end

     0   :  { %8 = vsyncpa [#allocation4], 0  ;;  %s1441_s0 = inlined_call_operand.hbm [shape: f32[40,128], index: 0, kind: input, shape index: {}]   ;;  %s1442_s1 = inlined_call_operand.hbm [shape: f32[128,128], index: 1, kind: input, shape index: {}]   ;;  %s1443_s2 = inlined_call_operand.vmem [shape: f32[1,128], index: 2, kind: input, shape index: {}]   ;;  %s1444_s3 = inlined_call_operand.hbm [shape: f32[40,128], index: 3, kind: output, shape index: {}]  }
   0x1   :  { %9 = vsyncpa [#allocation7], 0 }
   0x2   :  { %10 = vsyncpa [#allocation5], 0  ;;  %s1001_s12 = smov [#allocation3]   ;;  %s929_s16 = scalar_lea.hbm %s1441_s0, 640 }
   0x3   :  { %s16_s13 = sshll.u32 %s1001_s12, 4  ;;  %p930_p0 = scmp.ne.s32.totalorder %s1441_s0, %s929_s16  ;;  %s17_s13 = int_to_ptr.vmem [resolvable:$true] %s16_s13 }
   0x4   :  { %p933_p1 = scmp.lt.u32.totalorder %s929_s16, %s1441_s0 }
   0x6   :  { %p935_p2 = pnand %p933_p1, %p930_p0 }
   0x8   :  { %938 = shalt.err (!%p935_p2)
}
   0x9   :  { %s939_s21 = scalar_lea.vmem %s17_s13, 640  ;;  %p944_p4 = scmp.lt.s32.totalorder %s17_s13, %s17_s13 }
   0xa   :  { %p940_p3 = scmp.ne.s32.totalorder %s17_s13, %s939_s21  ;;  %p945_p5 = scmp.lt.s32.totalorder %s939_s21, %s939_s21 }
   0xc   :  { %p946_p6 = por %p945_p5, %p944_p4 }
   0xe   :  { %p947_p7 = pnand %p946_p6, %p940_p3 }
  0x10   :  { %950 = shalt.err (!%p947_p7)
}
  0x11   :  { %s1002_s22 = smov 128   ;;  %s1003_s23 = smov 8  }
  0x12   :  { %22 = dma.hbm_to_vmem [thread:$0]  %s1441_s0, 640, %s17_s13, [#allocation4], %s1002_s22, %s1002_s22, %s1003_s23  }
  0x13   :  { %s1004_s26 = smov [#allocation6]   ;;  %s951_s30 = scalar_lea.hbm %s1442_s1, 2048 }
  0x14   :  { %s28_s27 = sshll.u32 %s1004_s26, 4  ;;  %p952_p8 = scmp.ne.s32.totalorder %s1442_s1, %s951_s30  ;;  %s29_s27 = int_to_ptr.vmem [resolvable:$true] %s28_s27 }
  0x15   :  { %p955_p9 = scmp.lt.u32.totalorder %s951_s30, %s1442_s1 }
  0x17   :  { %p957_p10 = pnand %p955_p9, %p952_p8 }
  0x19   :  { %960 = shalt.err (!%p957_p10)
}
  0x1a   :  { %s961_s8 = scalar_lea.vmem %s29_s27, 2048  ;;  %p966_p12 = scmp.lt.s32.totalorder %s29_s27, %s29_s27 }
  0x1b   :  { %p962_p11 = scmp.ne.s32.totalorder %s29_s27, %s961_s8  ;;  %p967_p13 = scmp.lt.s32.totalorder %s961_s8, %s961_s8 }
  0x1d   :  { %p968_p0 = por %p967_p13, %p966_p12 }
  0x1f   :  { %p969_p1 = pnand %p968_p0, %p962_p11 }
  0x21   :  { %972 = shalt.err (!%p969_p1)
}
  0x22   :  { %34 = dma.hbm_to_vmem [thread:$0]  %s1442_s1, 2048, %s29_s27, [#allocation7], %s1002_s22, %s1002_s22, %s1003_s23  }
  0x23   :  { %995 = dma.done.wait [#allocation4], 640  }
  0x24   :  { %996 = vsyncadd [#allocation4], 4294966656 }
  0x25   :  { %997 = dma.done.wait [#allocation7], 2048  }
  0x26   :  { %998 = vsyncadd [#allocation7], 4294965248  ;;  %v1005_v0 = vmov 0.0|0.0   ;;  %vm1006_vm0 = vmmov 0   ;;  %v1007_v1 = vmov 0.0   ;;  %v62_v2 = vld [vmem:[#allocation6] sm:$0xff] }
  0x27   :  { %835 = vmatprep.subr.bf16.mxu0 %v1005_v0  ;;  %859 = vmatprep.subr.bf16.mxu1 %v1005_v0  ;;  %v63_v3 = vld [vmem:[#allocation6 + $0x8] sm:$0xff]  ;;  %v64_v4 = vld [vmem:[#allocation6 + $0x10] sm:$0xff]  ;;  %v65_v6 = vld [vmem:[#allocation6 + $0x18] sm:$0xff] }
  0x28   :  { %820 = vmatprep.mubr.msk.f32.mxu0 %vm1006_vm0, %v1007_v1  ;;  %829 = vmatprep.mubr.msk.f32.mxu1 %vm1006_vm0, %v1007_v1  ;;  %v836_v5 = vpack.c.bf16 %v63_v3, %v62_v2  ;;  %v839_v7 = vpack.c.bf16 %v65_v6, %v64_v4  ;;  %v66_v8 = vld [vmem:[#allocation6 + $0x20] sm:$0xff]  ;;  %v67_v9 = vld [vmem:[#allocation6 + $0x28] sm:$0xff]  ;;  %v68_v11 = vld [vmem:[#allocation6 + $0x30] sm:$0xff] }
  0x29   :  { %v842_v10 = vpack.c.bf16 %v67_v9, %v66_v8  ;;  %v69_v12 = vld [vmem:[#allocation6 + $0x38] sm:$0xff]  ;;  %v70_v14 = vld [vmem:[#allocation6 + $0x40] sm:$0xff]  ;;  %v71_v15 = vld [vmem:[#allocation6 + $0x48] sm:$0xff] }
  0x2a   :  { %837 = vmatpush3.bf16.msra.mxu0 %v836_v5  ;;  %867 = vmatpush3.bf16.msra.mxu1 %v836_v5  ;;  %v845_v13 = vpack.c.bf16 %v69_v12, %v68_v11  ;;  %v848_v16 = vpack.c.bf16 %v71_v15, %v70_v14  ;;  %v72_v17 = vld [vmem:[#allocation6 + $0x50] sm:$0xff]  ;;  %v73_v18 = vld [vmem:[#allocation6 + $0x58] sm:$0xff]  ;;  %v74_v20 = vld [vmem:[#allocation6 + $0x60] sm:$0xff]  ;;  %v1008_v11 = vmov 683565275  }
  0x2b   :  { %838 = vmatprep.subr.bf16.mxu0 %v1005_v0  ;;  %860 = vmatprep.subr.bf16.mxu1 %v1005_v0  ;;  %v851_v19 = vpack.c.bf16 %v73_v18, %v72_v17  ;;  %v75_v21 = vld [vmem:[#allocation6 + $0x68] sm:$0xff]  ;;  %v76_v23 = vld [vmem:[#allocation6 + $0x70] sm:$0xff]  ;;  %v77_v24 = vld [vmem:[#allocation6 + $0x78] sm:$0xff]  ;;  %v1009_v15 = vmov 2475754826  }
  0x2c   :  { %v854_v22 = vpack.c.bf16 %v75_v21, %v74_v20  ;;  %v857_v25 = vpack.c.bf16 %v77_v24, %v76_v23  ;;  %v57_v26 = vld [vmem:[#allocation3] sm:$0xff]  ;;  %v60_v27 = vld [vmem:[#allocation3 + $0x18] sm:$0xff]  ;;  %v58_v28 = vld [vmem:[#allocation3 + $0x8] sm:$0xff]  ;;  %v1010_v17 = vmov 2131351028  }
  0x2d   :  { %v61_v29 = vld [vmem:[#allocation3 + $0x20] sm:$0xff]  ;;  %v59_v30 = vld [vmem:[#allocation3 + $0x10] sm:$0xff]  ;;  %v1012_v21 = vmov 920167782  }
  0x2e   :  { %840 = vmatpush3.bf16.msra.mxu0 %v839_v7  ;;  %868 = vmatpush3.bf16.msra.mxu1 %v839_v7  ;;  %v1078_v31 = vld [vmem:[%s1443_s2] ss:$0 sm:$0xff]  ;;  %s1014_s2 = smov [#allocation8]  }
  0x2f   :  { %841 = vmatprep.subr.bf16.mxu0 %v1005_v0  ;;  %861 = vmatprep.subr.bf16.mxu1 %v1005_v0  ;;  %s733_s11 = sshll.u32 %s1014_s2, 4  ;;  %s734_s11 = int_to_ptr.vmem [resolvable:$true] %s733_s11 }
  0x30   :  { %s973_s12 = scalar_lea.vmem %s734_s11, 640  ;;  %p978_p3 = scmp.lt.s32.totalorder %s734_s11, %s734_s11 }
  0x31   :  { %p974_p2 = scmp.ne.s32.totalorder %s734_s11, %s973_s12  ;;  %p979_p4 = scmp.lt.s32.totalorder %s973_s12, %s973_s12 }
  0x32   :  { %843 = vmatpush3.bf16.msra.mxu0 %v842_v10  ;;  %869 = vmatpush3.bf16.msra.mxu1 %v842_v10 }
  0x33   :  { %844 = vmatprep.subr.bf16.mxu0 %v1005_v0  ;;  %862 = vmatprep.subr.bf16.mxu1 %v1005_v0  ;;  %p980_p5 = por %p979_p4, %p978_p3 }
  0x35   :  { %p981_p6 = pnand %p980_p5, %p974_p2 }
  0x36   :  { %846 = vmatpush3.bf16.msra.mxu0 %v845_v13  ;;  %870 = vmatpush3.bf16.msra.mxu1 %v845_v13 }
  0x37   :  { %847 = vmatprep.subr.bf16.mxu0 %v1005_v0  ;;  %863 = vmatprep.subr.bf16.mxu1 %v1005_v0 }
  0x3a   :  { %849 = vmatpush3.bf16.msra.mxu0 %v848_v16  ;;  %871 = vmatpush3.bf16.msra.mxu1 %v848_v16 }
  0x3b   :  { %850 = vmatprep.subr.bf16.mxu0 %v1005_v0  ;;  %864 = vmatprep.subr.bf16.mxu1 %v1005_v0 }
  0x3e   :  { %852 = vmatpush3.bf16.msra.mxu0 %v851_v19  ;;  %872 = vmatpush3.bf16.msra.mxu1 %v851_v19  ;;  %v1011_v19 = vmov 2102212464  }
  0x3f   :  { %853 = vmatprep.subr.bf16.mxu0 %v1005_v0  ;;  %865 = vmatprep.subr.bf16.mxu1 %v1005_v0 }
  0x42   :  { %855 = vmatpush3.bf16.msra.mxu0 %v854_v22  ;;  %873 = vmatpush3.bf16.msra.mxu1 %v854_v22 }
  0x43   :  { %856 = vmatprep.subr.bf16.mxu0 %v1005_v0  ;;  %866 = vmatprep.subr.bf16.mxu1 %v1005_v0 }
  0x46   :  { %858 = vmatpush3.bf16.msra.mxu0 %v857_v25  ;;  %874 = vmatpush3.bf16.msra.mxu1 %v857_v25 }
  0x49   :  { %821 = vmatmul.mubr.f32.vlgmr.msra.gmra.mrb[0].mxu0 %v57_v26  ;;  %830 = vmatmul.mubr.f32.vlgmr.msra.gmra.mrb[0].mxu1 %v60_v27 }
  0x4a   :  { %823 = vmatprep.mubr.msk.f32.mxu0 %vm1006_vm0, %v1007_v1  ;;  %832 = vmatprep.mubr.msk.f32.mxu1 %vm1006_vm0, %v1007_v1 }
  0x4d   :  { %824 = vmatmul.mubr.f32.gmra.mrb[2].mxu0 %v58_v28  ;;  %833 = vmatmul.mubr.f32.gmra.mrb[2].mxu1 %v61_v29  ;;  %v1013_v28 = vmov 1326507024  }
  0x4e   :  { %826 = vmatprep.mubr.msk.f32.mxu0 %vm1006_vm0, %v1007_v1 }
  0x51   :  { %827 = vmatmul.mubr.f32.gmra.mrb[4].mxu0 %v59_v30 }
 0x11c   :  { %v144_v32 = vpop.f32.mrb[0].mxu0  ;;  %v159_v33 = vpop.f32.mrb[0].mxu1 }
 0x11d   :  { %v193_v34 = vadd.f32 %v1078_v31, %v144_v32  ;;  %v196_v35 = vadd.f32 %v1078_v31, %v159_v33  ;;  %v822_v36 = vpop.f32.mrb[1].mxu0  ;;  %v831_v37 = vpop.f32.mrb[1].mxu1 }
 0x11f   :  { %v1082_v38 = vmul.f32 30.0, %v193_v34  ;;  %v1084_v39 = vmul.f32 30.0, %v196_v35 }
 0x120   :  { %v149_v40 = vpop.f32.mrb[2].mxu0  ;;  %v164_v41 = vpop.f32.mrb[2].mxu1 }
 0x121   :  { %v203_v42 = vand.u32 2147483647, %v1082_v38  ;;  %v206_v43 = vand.u32 2139095040, %v1082_v38  ;;  %v825_v44 = vpop.f32.mrb[3].mxu0  ;;  %v834_v45 = vpop.f32.mrb[3].mxu1  ;;  %v518_v47 = vand.u32 2139095040, %v1084_v39  ;;  %v194_v50 = vadd.f32 %v1078_v31, %v149_v40 }
 0x122   :  { %v515_v46 = vand.u32 2147483647, %v1084_v39  ;;  %v1102_v5 = vadd.f32 %v1078_v31, %v164_v41  ;;  %vm205_vm14 = vcmp.lt.s32.totalorder %v1082_v38, 0 }
 0x123   :  { %v207_v48 = vshrl.u32 %v206_v43, 23  ;;  %v210_v49 = vand.u32 8388607, %v203_v42  ;;  %v519_v51 = vshrl.u32 %v518_v47, 23  ;;  %v1097_v55 = vmul.f32 30.0, %v194_v50 }
 0x124   :  { %v522_v52 = vand.u32 8388607, %v515_v46  ;;  %v1095_v53 = vpop.f32.mrb[4].mxu0 }
 0x125   :  { %v747_v54 = vadd.s32 4294967169, %v207_v48  ;;  %v828_v56 = vpop.f32.mrb[5].mxu0  ;;  %v759_v57 = vadd.s32 4294967169, %v519_v51  ;;  %v211_v58 = vor.u32 8388608, %v210_v49  ;;  %v307_v62 = vand.u32 2147483647, %v1097_v55 }
 0x126   :  { %v523_v60 = vor.u32 8388608, %v522_v52  ;;  %v310_v63 = vand.u32 2139095040, %v1097_v55 }
 0x127   :  { %v213_v59 = vadd.s32 1, %v747_v54  ;;  %v525_v61 = vadd.s32 1, %v759_v57  ;;  %v1104_v6 = vshll.u32 %v211_v58, 8  ;;  %v1112_v9 = vand.u32 8388607, %v307_v62 }
 0x128   :  { %v311_v1 = vshrl.u32 %v310_v63, 23  ;;  %v1108_v8 = vshll.u32 %v523_v60, 8 }
 0x129   :  { %vm214_vm1 = vcmp.gt.s32.totalorder %v213_v59, 0  ;;  %vm526_vm2 = vcmp.gt.s32.totalorder %v525_v61, 0 }
 0x12a   :  { %v215_v0 = vsel %vm214_vm1, %v213_v59, 0  ;;  %v527_v4 = vsel %vm526_vm2, %v525_v61, 0  ;;  %v1115_v14 = vadd.s32 4294967169, %v311_v1  ;;  %vm1215_vm2 = vcmp.le.f32.partialorder %v203_v42, 0.7853982 }
 0x12b   :  { %v216_v2 = vshrl.u32 %v215_v0, 5  ;;  %v217_v3 = vand.u32 31, %v215_v0  ;;  %v1106_v7 = vshrl.u32 %v527_v4, 5  ;;  %v529_v13 = vand.u32 31, %v527_v4 }
 0x12d   :  { %v218_v10 = vsub.s32 32, %v217_v3  ;;  %v220_v12 = vshll.u32 %v1008_v11, %v217_v3  ;;  %v223_v16 = vshll.u32 %v1009_v15, %v217_v3  ;;  %v226_v18 = vshll.u32 %v1010_v17, %v217_v3 }
 0x12e   :  { %v229_v20 = vshll.u32 %v1011_v19, %v217_v3  ;;  %v232_v22 = vshll.u32 %v1012_v21, %v217_v3  ;;  %vm235_vm3 = vcmp.lt.s32.totalorder %v216_v2, 1  ;;  %vm237_vm4 = vcmp.lt.s32.totalorder %v216_v2, 3 }
 0x12f   :  { %v221_v23 = vshrl.u32 %v1009_v15, %v218_v10  ;;  %v224_v24 = vshrl.u32 %v1010_v17, %v218_v10  ;;  %v227_v25 = vshrl.u32 %v1011_v19, %v218_v10  ;;  %v219_v26 = vshrl.u32 %v1008_v11, %v218_v10 }
 0x130   :  { %v230_v27 = vshrl.u32 %v1012_v21, %v218_v10  ;;  %v233_v29 = vshrl.u32 %v1013_v28, %v218_v10  ;;  %v530_v34 = vsub.s32 32, %v529_v13  ;;  %vm238_vm5 = vcmp.lt.s32.totalorder %v216_v2, 4 }
 0x131   :  { %v222_v30 = vor.u32 %v221_v23, %v220_v12  ;;  %v225_v32 = vor.u32 %v224_v24, %v223_v16  ;;  %v228_v33 = vor.u32 %v227_v25, %v226_v18  ;;  %v532_v37 = vshll.u32 %v1008_v11, %v529_v13 }
 0x132   :  { %v231_v35 = vor.u32 %v230_v27, %v229_v20  ;;  %v234_v36 = vor.u32 %v233_v29, %v232_v22  ;;  %v535_v49 = vshll.u32 %v1009_v15, %v529_v13  ;;  %vm236_vm6 = vcmp.lt.s32.totalorder %v216_v2, 2 }
 0x133   :  { %v239_v40 = vsel %vm235_vm3, %v219_v26, %v222_v30  ;;  %v240_v41 = vsel %vm238_vm5, %v228_v33, 2102212464  ;;  %v243_v43 = vsel %vm235_vm3, %v222_v30, %v225_v32  ;;  %v247_v44 = vsel %vm235_vm3, %v225_v32, %v228_v33 }
 0x134   :  { %v241_v45 = vsel %vm237_vm4, %v225_v32, %v240_v41  ;;  %v244_v47 = vsel %vm238_vm5, %v231_v35, 920167782  ;;  %v248_v48 = vsel %vm238_vm5, %v234_v36, 1326507024  ;;  %v533_v52 = vshrl.u32 %v1009_v15, %v530_v34 }
 0x135   :  { %v245_v50 = vsel %vm237_vm4, %v228_v33, %v244_v47  ;;  %v249_v51 = vsel %vm237_vm4, %v231_v35, %v248_v48  ;;  %v242_v54 = vsel %vm236_vm6, %v239_v40, %v241_v45  ;;  %v536_v58 = vshrl.u32 %v1010_v17, %v530_v34 }
 0x136   :  { %v246_v56 = vsel %vm236_vm6, %v243_v43, %v245_v50  ;;  %v250_v57 = vsel %vm236_vm6, %v247_v44, %v249_v51  ;;  %v534_v0 = vor.u32 %v533_v52, %v532_v37  ;;  %v538_v2 = vshll.u32 %v1010_v17, %v529_v13 }
 0x137   :  { %v1138_v59 = vmul.u32.u64.low %v1104_v6, %v250_v57  ;;  %v1139_v60 = vmul.u32.u64.high %v1104_v6, %v250_v57, %v1138_v59  ;;  %v1142_v61 = vmul.u32.u64.low %v1104_v6, %v246_v56  ;;  %v1143_v63 = vmul.u32.u64.high %v1104_v6, %v246_v56, %v1142_v61 }
 0x138   :  { %v537_v1 = vor.u32 %v536_v58, %v535_v49  ;;  %v539_v3 = vshrl.u32 %v1011_v19, %v530_v34  ;;  %v541_v4 = vshll.u32 %v1011_v19, %v529_v13  ;;  %v542_v10 = vshrl.u32 %v1012_v21, %v530_v34 }
 0x139   :  { %v544_v12 = vshll.u32 %v1012_v21, %v529_v13  ;;  %v545_v16 = vshrl.u32 %v1013_v28, %v530_v34  ;;  %v258_v18 = vmul.u32 %v1104_v6, %v242_v54  ;;  %v531_v20 = vshrl.u32 %v1008_v11, %v530_v34 }
 0x13a   :  { %v540_v22 = vor.u32 %v539_v3, %v538_v2  ;;  %vm547_vm7 = vcmp.lt.s32.totalorder %v1106_v7, 1  ;;  %vm260_vm8 = vc.u32 %v1139_v60, %v1142_v61  ;;  %v261_v23 = vadd.s32 1, %v1143_v63 }
 0x13b   :  { %v543_v24 = vor.u32 %v542_v10, %v541_v4  ;;  %vm548_vm9 = vcmp.lt.s32.totalorder %v1106_v7, 2  ;;  %v546_v25 = vor.u32 %v545_v16, %v544_v12  ;;  %vm549_vm10 = vcmp.lt.s32.totalorder %v1106_v7, 3 }
 0x13c   :  { %vm550_vm11 = vcmp.lt.s32.totalorder %v1106_v7, 4  ;;  %v555_v13 = vsel %vm547_vm7, %v534_v0, %v537_v1  ;;  %v262_v6 = vsel %vm260_vm8, %v261_v23, %v1143_v63  ;;  %v559_v29 = vsel %vm547_vm7, %v537_v1, %v540_v22 }
 0x13d   :  { %v552_v26 = vsel %vm550_vm11, %v540_v22, 2102212464  ;;  %v556_v27 = vsel %vm550_vm11, %v543_v24, 920167782  ;;  %v263_v30 = vadd.s32 %v262_v6, %v258_v18  ;;  %v551_v32 = vsel %vm547_vm7, %v531_v20, %v534_v0 }
 0x13e   :  { %v557_v33 = vsel %vm549_vm10, %v540_v22, %v556_v27  ;;  %v560_v34 = vsel %vm550_vm11, %v546_v25, 1326507024  ;;  %v553_v35 = vsel %vm549_vm10, %v537_v1, %v552_v26  ;;  %v317_v40 = vadd.s32 1, %v1115_v14 }
 0x13f   :  { %v558_v36 = vsel %vm548_vm9, %v555_v13, %v557_v33  ;;  %v561_v37 = vsel %vm549_vm10, %v543_v24, %v560_v34  ;;  %v264_v41 = vadd.s32 536870912, %v263_v30  ;;  %v554_v50 = vsel %vm548_vm9, %v551_v32, %v553_v35 }
 0x140   :  { %v562_v43 = vsel %vm548_vm9, %v559_v29, %v561_v37  ;;  %v1166_v44 = vmul.u32.u64.low %v1108_v8, %v558_v36  ;;  %v1167_v45 = vmul.u32.u64.high %v1108_v8, %v558_v36, %v1166_v44  ;;  %vm318_vm12 = vcmp.gt.s32.totalorder %v317_v40, 0 }
 0x141   :  { %v1171_v47 = vmul.u32.u64.low %v1108_v8, %v562_v43  ;;  %v1172_v48 = vmul.u32.u64.high %v1108_v8, %v562_v43, %v1171_v47  ;;  %v1174_v49 = vshrl.u32 %v264_v41, 30  ;;  %v319_v14 = vsel %vm318_vm12, %v317_v40, 0 }
 0x142   :  { %v315_v51 = vor.u32 8388608, %v1112_v9  ;;  %v321_v52 = vand.u32 31, %v319_v14  ;;  %v573_v56 = vadd.s32 1, %v1167_v45  ;;  %v1182_v57 = vmul.f32 30.0, %v1102_v5 }
 0x143   :  { %v266_v54 = vshll.u32 %v1174_v49, 30  ;;  %v570_v58 = vmul.u32 %v1108_v8, %v554_v50  ;;  %vm572_vm13 = vc.u32 %v1172_v48, %v1166_v44  ;;  %v259_v0 = vadd.s32 %v1142_v61, %v1139_v60 }
 0x144   :  { %v322_v59 = vsub.s32 32, %v321_v52  ;;  %v574_v7 = vsel %vm572_vm13, %v573_v56, %v1167_v45  ;;  %v619_v9 = vand.u32 2147483647, %v1182_v57  ;;  %v1193_v3 = vshll.u32 %v315_v51, 8 }
 0x145   :  { %v1187_v63 = vsub.s32 %v263_v30, %v266_v54  ;;  %v575_v1 = vadd.s32 %v574_v7, %v570_v58  ;;  %v320_v8 = vshrl.u32 %v319_v14, 5  ;;  %v324_v4 = vshll.u32 %v1008_v11, %v321_v52 }
 0x146   :  { %v325_v2 = vshrl.u32 %v1009_v15, %v322_v59  ;;  %v328_v10 = vshrl.u32 %v1010_v17, %v322_v59  ;;  %v327_v16 = vshll.u32 %v1009_v15, %v321_v52  ;;  %v330_v18 = vshll.u32 %v1010_v17, %v321_v52 }
 0x147   :  { %v269_v5 = vsub.s32 0, %v1187_v63  ;;  %v576_v12 = vadd.s32 536870912, %v575_v1  ;;  %v331_v60 = vshrl.u32 %v1011_v19, %v322_v59  ;;  %v333_v22 = vshll.u32 %v1011_v19, %v321_v52 }
 0x148   :  { %v326_v20 = vor.u32 %v325_v2, %v324_v4  ;;  %v334_v23 = vshrl.u32 %v1012_v21, %v322_v59  ;;  %v329_v25 = vor.u32 %v328_v10, %v327_v16  ;;  %v337_v6 = vshrl.u32 %v1013_v28, %v322_v59 }
 0x149   :  { %v748_v61 = vmin.u32 %v269_v5, %v1187_v63  ;;  %v1205_v24 = vshrl.u32 %v576_v12, 30  ;;  %v332_v13 = vor.u32 %v331_v60, %v330_v18  ;;  %v336_v29 = vshll.u32 %v1012_v21, %v321_v52 }
 0x14a   :  { %v335_v27 = vor.u32 %v334_v23, %v333_v22  ;;  %v622_v30 = vand.u32 2139095040, %v1182_v57  ;;  %v289_v32 = vsub.s32 4, %v1174_v49  ;;  %v323_v34 = vshrl.u32 %v1008_v11, %v322_v59 }
 0x14b   :  { %v271_v26 = vclz %v748_v61  ;;  %v578_v33 = vshll.u32 %v1205_v24, 30  ;;  %vm339_vm15 = vcmp.lt.s32.totalorder %v320_v8, 1  ;;  %v338_v36 = vor.u32 %v337_v6, %v336_v29 }
 0x14c   :  { %vm341_vm0 = vcmp.lt.s32.totalorder %v320_v8, 3  ;;  %vm342_vm1 = vcmp.lt.s32.totalorder %v320_v8, 4  ;;  %v347_v43 = vsel %vm339_vm15, %v326_v20, %v329_v25  ;;  %v343_v47 = vsel %vm339_vm15, %v323_v34, %v326_v20 }
 0x14d   :  { %v749_v35 = vadd.s32 4294967294, %v271_v26  ;;  %v1219_v40 = vsub.s32 %v575_v1, %v578_v33  ;;  %v344_v41 = vsel %vm342_vm1, %v332_v13, 2102212464  ;;  %v348_v45 = vsel %vm342_vm1, %v335_v27, 920167782 }
 0x14e   :  { %v345_v50 = vsel %vm341_vm0, %v329_v25, %v344_v41  ;;  %v349_v14 = vsel %vm341_vm0, %v332_v13, %v348_v45  ;;  %vm340_vm4 = vcmp.lt.s32.totalorder %v320_v8, 2  ;;  %v623_v52 = vshrl.u32 %v622_v30, 23 }
 0x14f   :  { %vm750_vm3 = vcmp.lt.s32.totalorder %v749_v35, 0  ;;  %v581_v42 = vsub.s32 0, %v1219_v40  ;;  %v290_v58 = vsel %vm205_vm14, %v289_v32, %v1174_v49  ;;  %vm517_vm5 = vcmp.lt.s32.totalorder %v1084_v39, 0 }
 0x150   :  { %v274_v51 = vsel %vm750_vm3, 0, %v749_v35  ;;  %v350_v59 = vsel %vm340_vm4, %v347_v43, %v349_v14  ;;  %v346_v1 = vsel %vm340_vm4, %v343_v47, %v345_v50  ;;  %v351_v2 = vsel %vm339_vm15, %v329_v25, %v332_v13 }
 0x151   :  { %v275_v54 = vsub.s32 32, %v274_v51  ;;  %v279_v56 = vsub.s32 4294967266, %v274_v51  ;;  %v760_v7 = vmin.u32 %v581_v42, %v1219_v40  ;;  %v352_v5 = vsel %vm342_vm1, %v338_v36, 1326507024 }
 0x152   :  { %v276_v4 = vshll.u32 %v1187_v63, %v274_v51  ;;  %v353_v16 = vsel %vm341_vm0, %v335_v27, %v352_v5  ;;  %v1241_v60 = vmul.u32.u64.low %v1193_v3, %v350_v59  ;;  %v1242_v61 = vmul.u32.u64.high %v1193_v3, %v350_v59, %v1241_v60 }
 0x153   :  { %v277_v10 = vshrl.u32 %v259_v0, %v275_v54  ;;  %v280_v12 = vadd.s32 127, %v279_v56  ;;  %v583_v18 = vclz %v760_v7  ;;  %v354_v49 = vsel %vm340_vm4, %v351_v2, %v353_v16 }
 0x154   :  { %v1246_v23 = vmul.u32.u64.low %v1193_v3, %v354_v49  ;;  %v1247_v25 = vmul.u32.u64.high %v1193_v3, %v354_v49, %v1246_v23  ;;  %vm1251_vm6 = vcmp.le.f32.partialorder %v515_v46, 0.7853982  ;;  %v601_v8 = vsub.s32 4, %v1205_v24 }
 0x155   :  { %v278_v20 = vor.u32 %v277_v10, %v276_v4  ;;  %v281_v22 = vshll.u32 %v280_v12, 23  ;;  %v761_v0 = vadd.s32 4294967294, %v583_v18  ;;  %v763_v13 = vadd.s32 4294967169, %v623_v52 }
 0x156   :  { %v292_v26 = vsel %vm1215_vm2, 0, %v290_v58  ;;  %v571_v27 = vadd.s32 %v1166_v44, %v1172_v48  ;;  %v1262_v29 = vand.u32 8388607, %v619_v9  ;;  %v362_v46 = vmul.u32 %v1193_v3, %v346_v1 }
 0x157   :  { %v282_v6 = vor.u32 4788187, %v281_v22  ;;  %vm762_vm7 = vcmp.lt.s32.totalorder %v761_v0, 0  ;;  %v365_v30 = vadd.s32 1, %v1242_v61  ;;  %v629_v32 = vadd.s32 1, %v763_v13 }
 0x158   :  { %v285_v34 = vcvt.s32.f32 %v278_v20  ;;  %v586_v35 = vsel %vm762_vm7, 0, %v761_v0  ;;  %vm364_vm8 = vc.u32 %v1247_v25, %v1241_v60  ;;  %v602_v44 = vsel %vm517_vm5, %v601_v8, %v1205_v24 }
 0x159   :  { %v283_v33 = vand.u32 2147483647, %v282_v6  ;;  %v587_v36 = vsub.s32 32, %v586_v35  ;;  %v591_v41 = vsub.s32 4294967266, %v586_v35  ;;  %v366_v48 = vsel %vm364_vm8, %v365_v30, %v1242_v61 }
 0x15a   :  { %v296_v45 = vadd.s32 3, %v292_v26  ;;  %v367_v3 = vadd.s32 %v366_v48, %v362_v46  ;;  %vm630_vm9 = vcmp.gt.s32.totalorder %v629_v32, 0  ;;  %v588_v47 = vshll.u32 %v1219_v40, %v586_v35 }
 0x15b   :  { %v286_v43 = vmul.f32 %v285_v34, %v283_v33  ;;  %v589_v50 = vshrl.u32 %v571_v27, %v587_v36  ;;  %v592_v14 = vadd.s32 127, %v591_v41  ;;  %v631_v51 = vsel %vm630_vm9, %v629_v32, 0 }
 0x15c   :  { %v604_v52 = vsel %vm1251_vm6, 0, %v602_v44  ;;  %v368_v54 = vadd.s32 536870912, %v367_v3  ;;  %v633_v56 = vand.u32 31, %v631_v51  ;;  %v195_v40 = vadd.f32 %v1078_v31, %v1095_v53 }
 0x15d   :  { %v287_v42 = vxor.u32 2147483648, %v286_v43  ;;  %v590_v58 = vor.u32 %v589_v50, %v588_v47  ;;  %v593_v59 = vshll.u32 %v592_v14, 23  ;;  %v1284_v5 = vand.u32 3, %v296_v45 }
 0x15e   :  { %v1277_v7 = vshrl.u32 %v368_v54, 30  ;;  %v634_v1 = vsub.s32 32, %v633_v56  ;;  %v1286_v10 = vadd.s32 3, %v604_v52  ;;  %v627_v16 = vor.u32 8388608, %v1262_v29 }
 0x15f   :  { %v288_v24 = vsel %vm205_vm14, %v287_v42, %v286_v43  ;;  %v594_v4 = vor.u32 4788187, %v593_v59  ;;  %v636_v18 = vshll.u32 %v1008_v11, %v633_v56  ;;  %v639_v49 = vshll.u32 %v1009_v15, %v633_v56 }
 0x160   :  { %v291_v2 = vsel %vm1215_vm2, %v1082_v38, %v288_v24  ;;  %v370_v12 = vshll.u32 %v1277_v7, 30  ;;  %v597_v20 = vcvt.s32.f32 %v590_v58  ;;  %v637_v31 = vshrl.u32 %v1009_v15, %v634_v1 }
 0x161   :  { %v595_v61 = vand.u32 2147483647, %v594_v4  ;;  %v640_v53 = vshrl.u32 %v1010_v17, %v634_v1  ;;  %909 = vcosq.f32 %v291_v2  ;;  %v642_v22 = vshll.u32 %v1010_v17, %v633_v56 }
 0x162   :  { %v1294_v37 = vsub.s32 %v367_v3, %v370_v12  ;;  %v643_v23 = vshrl.u32 %v1011_v19, %v634_v1  ;;  %911 = vsinq.f32 %v291_v2  ;;  %v632_v8 = vshrl.u32 %v631_v51, 5 }
 0x163   :  { %v598_v0 = vmul.f32 %v597_v20, %v595_v61  ;;  %v1298_v13 = vmul.f32 30.0, %v195_v40  ;;  %v638_v26 = vor.u32 %v637_v31, %v636_v18  ;;  %v641_v27 = vor.u32 %v640_v53, %v639_v49 }
 0x164   :  { %v373_v6 = vsub.s32 0, %v1294_v37  ;;  %v645_v29 = vshll.u32 %v1011_v19, %v633_v56  ;;  %vm309_vm10 = vcmp.lt.s32.totalorder %v1097_v55, 0  ;;  %v644_v46 = vor.u32 %v643_v23, %v642_v22 }
 0x165   :  { %v646_v30 = vshrl.u32 %v1012_v21, %v634_v1  ;;  %v648_v32 = vshll.u32 %v1012_v21, %v633_v56  ;;  %v649_v33 = vshrl.u32 %v1013_v28, %v634_v1  ;;  %v363_v34 = vadd.s32 %v1241_v60, %v1247_v25 }
 0x166   :  { %v752_v35 = vmin.u32 %v373_v6, %v1294_v37  ;;  %v635_v36 = vshrl.u32 %v1008_v11, %v634_v1  ;;  %v1310_v41 = vshll.u32 %v627_v16, 8  ;;  %v393_v44 = vsub.s32 4, %v1277_v7 }
 0x167   :  { %v647_v48 = vor.u32 %v646_v30, %v645_v29  ;;  %v650_v43 = vor.u32 %v649_v33, %v648_v32  ;;  %v414_v45 = vand.u32 2139095040, %v1298_v13  ;;  %v599_v3 = vxor.u32 2147483648, %v598_v0 }
 0x168   :  { %vm1316_vm11 = vcmp.le.f32.partialorder %v307_v62, 0.7853982  ;;  %v375_v60 = vclz %v752_v35  ;;  %vm651_vm12 = vcmp.lt.s32.totalorder %v632_v8, 1  ;;  %vm654_vm13 = vcmp.lt.s32.totalorder %v632_v8, 4 }
 0x169   :  { %vm653_vm14 = vcmp.lt.s32.totalorder %v632_v8, 3  ;;  %v656_v25 = vsel %vm654_vm13, %v644_v46, 2102212464  ;;  %v659_v50 = vsel %vm651_vm12, %v638_v26, %v641_v27  ;;  %v660_v14 = vsel %vm654_vm13, %v647_v48, 920167782 }
 0x16a   :  { %v753_v51 = vadd.s32 4294967294, %v375_v60  ;;  %vm652_vm15 = vcmp.lt.s32.totalorder %v632_v8, 2  ;;  %v655_v42 = vsel %vm651_vm12, %v635_v36, %v638_v26  ;;  %v661_v52 = vsel %vm653_vm14, %v644_v46, %v660_v14 }
 0x16b   :  { %vm299_vm0 = vcmp.eq.s32.totalorder %v1284_v5, 0  ;;  %v657_v54 = vsel %vm653_vm14, %v641_v27, %v656_v25  ;;  %v662_v56 = vsel %vm652_vm15, %v659_v50, %v661_v52  ;;  %v663_v62 = vsel %vm651_vm12, %v641_v27, %v644_v46  ;;  %v910_v59 = vpop.eup %909 }
 0x16c   :  { %v664_v58 = vsel %vm654_vm13, %v650_v43, 1326507024  ;;  %vm754_vm1 = vcmp.lt.s32.totalorder %v753_v51, 0  ;;  %v1323_v1 = vmul.u32.u64.low %v1310_v41, %v662_v56  ;;  %v1324_v40 = vmul.u32.u64.high %v1310_v41, %v662_v56, %v1323_v1  ;;  %v912_v2 = vpop.eup %911 }
 0x16d   :  { %v665_v24 = vsel %vm653_vm14, %v647_v48, %v664_v58  ;;  %v378_v4 = vsel %vm754_vm1, 0, %v753_v51  ;;  %v411_v16 = vand.u32 2147483647, %v1298_v13  ;;  %v415_v18 = vshrl.u32 %v414_v45, 23 }
 0x16e   :  { %v666_v12 = vsel %vm652_vm15, %v663_v62, %v665_v24  ;;  %vm298_vm2 = vcmp.lt.s32.totalorder %v1284_v5, 2  ;;  %v600_v49 = vsel %vm517_vm5, %v599_v3, %v598_v0  ;;  %v379_v61 = vsub.s32 32, %v378_v4 }
 0x16f   :  { %v383_v20 = vsub.s32 4294967266, %v378_v4  ;;  %v394_v31 = vsel %vm309_vm10, %v393_v44, %v1277_v7  ;;  %v658_v53 = vsel %vm652_vm15, %v655_v42, %v657_v54  ;;  %v755_v6 = vadd.s32 4294967169, %v415_v18 }
 0x170   :  { %v1337_v22 = vmul.u32.u64.low %v1310_v41, %v666_v12  ;;  %v1338_v23 = vmul.u32.u64.high %v1310_v41, %v666_v12, %v1337_v22  ;;  %v380_v26 = vshll.u32 %v1294_v37, %v378_v4  ;;  %v381_v27 = vshrl.u32 %v363_v34, %v379_v61 }
 0x171   :  { %v384_v29 = vadd.s32 127, %v383_v20  ;;  %v677_v46 = vadd.s32 1, %v1324_v40  ;;  %v396_v0 = vsel %vm1316_vm11, 0, %v394_v31  ;;  %v421_v30 = vadd.s32 1, %v755_v6 }
 0x172   :  { %v300_v32 = vxor.u32 2147483648, %v912_v2  ;;  %v303_v33 = vxor.u32 2147483648, %v910_v59  ;;  %v603_v7 = vsel %vm1251_vm6, %v1084_v39, %v600_v49  ;;  %v382_v8 = vor.u32 %v381_v27, %v380_v26 }
 0x173   :  { %v385_v35 = vshll.u32 %v384_v29, 23  ;;  %v674_v36 = vmul.u32 %v1310_v41, %v658_v53  ;;  %vm676_vm3 = vc.u32 %v1338_v23, %v1323_v1  ;;  %v418_v37 = vand.u32 8388607, %v411_v16 }
 0x174   :  { %vm422_vm4 = vcmp.gt.s32.totalorder %v421_v30, 0  ;;  %v301_v34 = vsel %vm299_vm0, %v910_v59, %v300_v32  ;;  %v678_v48 = vsel %vm676_vm3, %v677_v46, %v1324_v40  ;;  %vm302_vm5 = vcmp.eq.s32.totalorder %v1284_v5, 2 }
 0x175   :  { %v386_v44 = vor.u32 4788187, %v385_v35  ;;  %v423_v43 = vsel %vm422_vm4, %v421_v30, 0  ;;  %v400_v63 = vadd.s32 3, %v396_v0  ;;  %v679_v45 = vadd.s32 %v678_v48, %v674_v36 }
 0x176   :  { %v425_v3 = vand.u32 31, %v423_v43  ;;  %v304_v41 = vsel %vm302_vm5, %v303_v33, %v912_v2  ;;  %913 = vcosq.f32 %v603_v7  ;;  %v389_v25 = vcvt.s32.f32 %v382_v8 }
 0x177   :  { %v387_v60 = vand.u32 2147483647, %v386_v44  ;;  %v305_v50 = vsel %vm298_vm2, %v301_v34, %v304_v41  ;;  %915 = vsinq.f32 %v603_v7  ;;  %v680_v14 = vadd.s32 536870912, %v679_v45 }
 0x178   :  { %v419_v51 = vor.u32 8388608, %v418_v37  ;;  %v426_v42 = vsub.s32 32, %v425_v3  ;;  %v428_v54 = vshll.u32 %v1008_v11, %v425_v3  ;;  %v431_v56 = vshll.u32 %v1009_v15, %v425_v3 }
 0x179   :  { %v390_v52 = vmul.f32 %v389_v25, %v387_v60  ;;  %v434_v62 = vshll.u32 %v1010_v17, %v425_v3  ;;  %v1361_v58 = vshrl.u32 %v680_v14, 30  ;;  %v437_v5 = vshll.u32 %v1011_v19, %v425_v3 }
 0x17a   :  { %v429_v59 = vshrl.u32 %v1009_v15, %v426_v42  ;;  %v432_v24 = vshrl.u32 %v1010_v17, %v426_v42  ;;  %v435_v2 = vshrl.u32 %v1011_v19, %v426_v42  ;;  %v438_v4 = vshrl.u32 %v1012_v21, %v426_v42 }
 0x17b   :  { %v391_v40 = vxor.u32 2147483648, %v390_v52  ;;  %v441_v12 = vshrl.u32 %v1013_v28, %v426_v42  ;;  %vm295_vm6 = vweird.f32 %v1082_v38  ;;  %v682_v18 = vshll.u32 %v1361_v58, 30 }
 0x17c   :  { %v424_v49 = vshrl.u32 %v423_v43, 5  ;;  %v430_v61 = vor.u32 %v429_v59, %v428_v54  ;;  %v440_v20 = vshll.u32 %v1012_v21, %v425_v3  ;;  %v433_v17 = vor.u32 %v432_v24, %v431_v56 }
 0x17d   :  { %v392_v15 = vsel %vm309_vm10, %v391_v40, %v390_v52  ;;  %v436_v31 = vor.u32 %v435_v2, %v434_v62  ;;  %v439_v53 = vor.u32 %v438_v4, %v437_v5  ;;  %v609_v19 = vand.u32 3, %v1286_v10 }
 0x17e   :  { %v395_v28 = vsel %vm1316_vm11, %v1097_v55, %v392_v15  ;;  %v1378_v22 = vand.u32 3, %v400_v63  ;;  %v1380_v6 = vsub.s32 %v679_v45, %v682_v18  ;;  %v427_v26 = vshrl.u32 %v1008_v11, %v426_v42 }
 0x17f   :  { %917 = vcosq.f32 %v395_v28  ;;  %v442_v21 = vor.u32 %v441_v12, %v440_v20  ;;  %v459_v27 = vshll.u32 %v419_v51, 8  ;;  %vm443_vm7 = vcmp.lt.s32.totalorder %v424_v49, 1 }
 0x180   :  { %919 = vsinq.f32 %v395_v28  ;;  %v685_v29 = vsub.s32 0, %v1380_v6  ;;  %vm446_vm8 = vcmp.lt.s32.totalorder %v424_v49, 4  ;;  %v914_v46 = vpop.eup %913  ;;  %vm445_vm9 = vcmp.lt.s32.totalorder %v424_v49, 3 }
 0x181   :  { %v448_v10 = vsel %vm446_vm8, %v436_v31, 2102212464  ;;  %v451_v0 = vsel %vm443_vm7, %v430_v61, %v433_v17  ;;  %v452_v47 = vsel %vm446_vm8, %v439_v53, 920167782  ;;  %v916_v30 = vpop.eup %915  ;;  %vm444_vm10 = vcmp.lt.s32.totalorder %v424_v49, 2 }
 0x182   :  { %v764_v32 = vmin.u32 %v685_v29, %v1380_v6  ;;  %v447_v33 = vsel %vm443_vm7, %v427_v26, %v430_v61  ;;  %v453_v7 = vsel %vm445_vm9, %v436_v31, %v452_v47  ;;  %v449_v8 = vsel %vm445_vm9, %v433_v17, %v448_v10 }
 0x183   :  { %v454_v11 = vsel %vm444_vm10, %v451_v0, %v453_v7  ;;  %v455_v35 = vsel %vm443_vm7, %v433_v17, %v436_v31  ;;  %v456_v36 = vsel %vm446_vm8, %v442_v21, 1326507024  ;;  %vm607_vm11 = vweird.f32 %v1084_v39 }
 0x184   :  { %v687_v37 = vclz %v764_v32  ;;  %v457_v34 = vsel %vm445_vm9, %v439_v53, %v456_v36  ;;  %v1385_v44 = vmul.u32.u64.low %v459_v27, %v454_v11  ;;  %v1386_v48 = vmul.u32.u64.high %v459_v27, %v454_v11, %v1385_v44 }
 0x185   :  { %v675_v43 = vadd.s32 %v1323_v1, %v1338_v23  ;;  %v458_v63 = vsel %vm444_vm10, %v455_v35, %v457_v34  ;;  %v306_v45 = vsel %vm295_vm6, nan, %v305_v50  ;;  %v450_v41 = vsel %vm444_vm10, %v447_v33, %v449_v8 }
 0x186   :  { %v765_v3 = vadd.s32 4294967294, %v687_v37  ;;  %v1394_v60 = vmul.u32.u64.low %v459_v27, %v458_v63  ;;  %v1395_v25 = vmul.u32.u64.high %v459_v27, %v458_v63, %v1394_v60  ;;  %723 = vst [vmem:[#allocation8] sm:$0xff] %v306_v45  ;;  %vm403_vm12 = vcmp.eq.s32.totalorder %v1378_v22, 0 }
 0x187   :  { %vm406_vm13 = vcmp.eq.s32.totalorder %v1378_v22, 2  ;;  %v612_v14 = vxor.u32 2147483648, %v916_v30  ;;  %v615_v51 = vxor.u32 2147483648, %v914_v46  ;;  %v469_v42 = vadd.s32 1, %v1386_v48 }
 0x188   :  { %vm766_vm14 = vcmp.lt.s32.totalorder %v765_v3, 0  ;;  %vm611_vm15 = vcmp.eq.s32.totalorder %v609_v19, 0  ;;  %vm614_vm0 = vcmp.eq.s32.totalorder %v609_v19, 2  ;;  %v466_v23 = vmul.u32 %v459_v27, %v450_v41 }
 0x189   :  { %v918_v1 = vpop.eup %917  ;;  %v690_v38 = vsel %vm766_vm14, 0, %v765_v3  ;;  %v613_v50 = vsel %vm611_vm15, %v914_v46, %v612_v14  ;;  %v616_v52 = vsel %vm614_vm0, %v615_v51, %v916_v30  ;;  %vm610_vm1 = vcmp.lt.s32.totalorder %v609_v19, 2 }
 0x18a   :  { %v920_v54 = vpop.eup %919  ;;  %v691_v56 = vsub.s32 32, %v690_v38  ;;  %v692_v62 = vshll.u32 %v1380_v6, %v690_v38  ;;  %v695_v59 = vsub.s32 4294967266, %v690_v38  ;;  %vm468_vm2 = vc.u32 %v1395_v25, %v1385_v44 }
 0x18b   :  { %v404_v24 = vxor.u32 2147483648, %v920_v54  ;;  %v407_v5 = vxor.u32 2147483648, %v918_v1  ;;  %v617_v40 = vsel %vm610_vm1, %v613_v50, %v616_v52  ;;  %v470_v12 = vsel %vm468_vm2, %v469_v42, %v1386_v48 }
 0x18c   :  { %v693_v2 = vshrl.u32 %v675_v43, %v691_v56  ;;  %v696_v4 = vadd.s32 127, %v695_v59  ;;  %v618_v18 = vsel %vm607_vm11, nan, %v617_v40  ;;  %v471_v49 = vadd.s32 %v470_v12, %v466_v23 }
 0x18d   :  { %vm402_vm3 = vcmp.lt.s32.totalorder %v1378_v22, 2  ;;  %v405_v61 = vsel %vm403_vm12, %v918_v1, %v404_v24  ;;  %v408_v20 = vsel %vm406_vm13, %v407_v5, %v920_v54  ;;  %726 = vst [vmem:[#allocation8 + $0x18] sm:$0xff] %v618_v18  ;;  %vm399_vm4 = vweird.f32 %v1097_v55 }
 0x18e   :  { %v694_v15 = vor.u32 %v693_v2, %v692_v62  ;;  %v697_v17 = vshll.u32 %v696_v4, 23  ;;  %v409_v31 = vsel %vm402_vm3, %v405_v61, %v408_v20  ;;  %v472_v53 = vadd.s32 536870912, %v471_v49 }
 0x18f   :  { %v410_v19 = vsel %vm399_vm4, nan, %v409_v31  ;;  %v705_v29 = vsub.s32 4, %v1361_v58  ;;  %vm621_vm5 = vcmp.lt.s32.totalorder %v1182_v57, 0  ;;  %vm620_vm6 = vcmp.le.f32.partialorder %v619_v9, 0.7853982 }
 0x190   :  { %v698_v28 = vor.u32 4788187, %v697_v17  ;;  %724 = vst [vmem:[#allocation8 + $0x8] sm:$0xff] %v410_v19  ;;  %v473_v39 = vshrl.u32 %v472_v53, 30  ;;  %v701_v26 = vcvt.s32.f32 %v694_v15  ;;  %v467_v35 = vadd.s32 %v1385_v44, %v1395_v25 }
 0x191   :  { %v706_v0 = vsel %vm621_vm5, %v705_v29, %v1361_v58  ;;  %vm711_vm11 = vweird.f32 %v1182_v57  ;;  %vm413_vm12 = vcmp.lt.s32.totalorder %v1298_v13, 0  ;;  %vm412_vm13 = vcmp.le.f32.partialorder %v411_v16, 0.7853982 }
 0x192   :  { %v699_v6 = vand.u32 2147483647, %v698_v28  ;;  %v474_v21 = vshll.u32 %v473_v39, 30  ;;  %v708_v32 = vsel %vm620_vm6, 0, %v706_v0  ;;  %v497_v50 = vsub.s32 4, %v473_v39 }
 0x193   :  { %v712_v8 = vadd.s32 3, %v708_v32  ;;  %vm503_vm1 = vweird.f32 %v1298_v13 }
 0x194   :  { %v702_v27 = vmul.f32 %v701_v26, %v699_v6  ;;  %v475_v46 = vsub.s32 %v471_v49, %v474_v21  ;;  %v498_v56 = vsel %vm413_vm12, %v497_v50, %v473_v39 }
 0x195   :  { %v713_v9 = vand.u32 3, %v712_v8  ;;  %v500_v59 = vsel %vm412_vm13, 0, %v498_v56 }
 0x196   :  { %v703_v22 = vxor.u32 2147483648, %v702_v27  ;;  %v477_v10 = vsub.s32 0, %v475_v46 }
 0x197   :  { %vm718_vm8 = vcmp.eq.s32.totalorder %v713_v9, 2  ;;  %vm715_vm9 = vcmp.eq.s32.totalorder %v713_v9, 0  ;;  %vm714_vm10 = vcmp.lt.s32.totalorder %v713_v9, 2 }
 0x198   :  { %v704_v55 = vsel %vm621_vm5, %v703_v22, %v702_v27  ;;  %v756_v30 = vmin.u32 %v477_v10, %v475_v46 }
 0x199   :  { %v707_v47 = vsel %vm620_vm6, %v1182_v57, %v704_v55  ;;  %v504_v57 = vadd.s32 3, %v500_v59 }
 0x19a   :  { %921 = vcosq.f32 %v707_v47  ;;  %v479_v33 = vclz %v756_v30 }
 0x19b   :  { %923 = vsinq.f32 %v707_v47  ;;  %v505_v24 = vand.u32 3, %v504_v57 }
 0x19c   :  { %v757_v7 = vadd.s32 4294967294, %v479_v33 }
 0x19d   :  { %vm510_vm14 = vcmp.eq.s32.totalorder %v505_v24, 2  ;;  %vm507_vm15 = vcmp.eq.s32.totalorder %v505_v24, 0  ;;  %vm506_vm0 = vcmp.lt.s32.totalorder %v505_v24, 2 }
 0x19e   :  { %vm758_vm7 = vcmp.lt.s32.totalorder %v757_v7, 0 }
 0x19f   :  { %v482_v11 = vsel %vm758_vm7, 0, %v757_v7 }
 0x1a0   :  { %v483_v36 = vsub.s32 32, %v482_v11  ;;  %v487_v37 = vsub.s32 4294967266, %v482_v11  ;;  %v484_v34 = vshll.u32 %v475_v46, %v482_v11 }
 0x1a2   :  { %v485_v48 = vshrl.u32 %v467_v35, %v483_v36  ;;  %v488_v58 = vadd.s32 127, %v487_v37 }
 0x1a4   :  { %v922_v43 = vpop.eup %921  ;;  %v486_v45 = vor.u32 %v485_v48, %v484_v34  ;;  %v489_v3 = vshll.u32 %v488_v58, 23 }
 0x1a5   :  { %v924_v63 = vpop.eup %923  ;;  %v719_v41 = vxor.u32 2147483648, %v922_v43 }
 0x1a6   :  { %v716_v60 = vxor.u32 2147483648, %v924_v63  ;;  %v490_v14 = vor.u32 4788187, %v489_v3  ;;  %v493_v25 = vcvt.s32.f32 %v486_v45 }
 0x1a7   :  { %v720_v51 = vsel %vm718_vm8, %v719_v41, %v924_v63 }
 0x1a8   :  { %v717_v42 = vsel %vm715_vm9, %v922_v43, %v716_v60  ;;  %v491_v44 = vand.u32 2147483647, %v490_v14 }
 0x1a9   :  { %v721_v1 = vsel %vm714_vm10, %v717_v42, %v720_v51 }
 0x1aa   :  { %v722_v38 = vsel %vm711_vm11, nan, %v721_v1  ;;  %v494_v23 = vmul.f32 %v493_v25, %v491_v44 }
 0x1ab   :  { %727 = vst [vmem:[#allocation8 + $0x20] sm:$0xff] %v722_v38 }
 0x1ac   :  { %v495_v52 = vxor.u32 2147483648, %v494_v23 }
 0x1ae   :  { %v496_v54 = vsel %vm413_vm12, %v495_v52, %v494_v23 }
 0x1af   :  { %v499_v62 = vsel %vm412_vm13, %v1298_v13, %v496_v54 }
 0x1b0   :  { %925 = vcosq.f32 %v499_v62 }
 0x1b1   :  { %927 = vsinq.f32 %v499_v62 }
 0x1ba   :  { %v926_v5 = vpop.eup %925 }
 0x1bb   :  { %v928_v40 = vpop.eup %927  ;;  %v511_v2 = vxor.u32 2147483648, %v926_v5 }
 0x1bc   :  { %v508_v4 = vxor.u32 2147483648, %v928_v40 }
 0x1bd   :  { %v512_v12 = vsel %vm510_vm14, %v511_v2, %v928_v40 }
 0x1be   :  { %v509_v16 = vsel %vm507_vm15, %v926_v5, %v508_v4 }
 0x1bf   :  { %v513_v18 = vsel %vm506_vm0, %v509_v16, %v512_v12 }
 0x1c0   :  { %v514_v49 = vsel %vm503_vm1, nan, %v513_v18 }
 0x1c1   :  { %725 = vst [vmem:[#allocation8 + $0x10] sm:$0xff] %v514_v49 }
 0x1c2   :  { %984 = shalt.err (!%p981_p6)
}
 0x1c3   :  { %s985_s15 = scalar_lea.hbm %s1444_s3, 640 }
 0x1c4   :  { %p986_p7 = scmp.ne.s32.totalorder %s1444_s3, %s985_s15  ;;  %p989_p8 = scmp.lt.u32.totalorder %s985_s15, %s1444_s3 }
 0x1c6   :  { %p991_p9 = pnand %p989_p8, %p986_p7 }
 0x1c8   :  { %994 = shalt.err (!%p991_p9)
}
 0x1c9   :  { %739 = dma.vmem_to_hbm [thread:$0]  %s734_s11, 640, %s1444_s3, [#allocation5], %s1002_s22, %s1002_s22, %s1003_s23  }
 0x1ca   :  { %999 = dma.done.wait [#allocation5], 640  }
 0x1cb   :  { %1000 = vsyncadd [#allocation5], 4294966656 }
 0x1cc   :  { %743 = vsyncpa [#allocation4], 1 }
 0x1cd   :  { %744 = vsyncpa [#allocation7], 1 }
 0x1ce   :  { %745 = vsyncpa [#allocation5], 1 }

</bundles_post_ra>
